<compile_context>
chip_gen: v6e
topology: v6e:2x2x1
jax: 0.10.0
libtpu: 0.0.40
codegen_flags: <defaults>
</compile_context>

<pallas_src>
import functools

import jax
import jax.numpy as jnp
from jax.experimental import pallas as pl
from jax.experimental.pallas import tpu as pltpu

_MIB = 1 << 20


def _vmem_capacity_bytes():
    """Chip VMEM capacity; conservative (v7x, 64 MiB) fallback if unavailable."""
    try:
        return int(pltpu.get_tpu_info().vmem_capacity_bytes)
    except Exception:
        return 64 * _MIB


def _resident_vmem_needed(tb, d, weight_bytes):
    """VMEM footprint estimate for the weight-resident path at batch tile tb."""
    f32 = 4
    tile = tb * d * f32
    return (
        2 * tile            # x tile, double-buffered
        + 2 * tile          # attn output tile, double-buffered
        + 2 * tb * f32      # h output tile, double-buffered
        + weight_bytes      # Wc.T, single-buffered (constant index)
        + 4 * d * f32       # bc, wf, single-buffered
        + 3 * tile          # proj / e / attn intermediates (can't fuse past row-sum)
    )


def _pick_tb(b, d, weight_bytes, vmem_cap):
    """Batch tile size: multiple of 128 (or == B), >= 2 grid programs for B >= 256."""
    if b < 256:
        # Single tile: tiny batches don't amortise the ~0.35us per-step
        # overhead, and TB == B trivially satisfies the (8, 128) constraint.
        return b
    # Candidates are multiples of 128 (keeps every block (8,128)-legal) and are
    # capped at ~ceil(B/2) so the batch grid has >= 2 programs -> both v7x
    # TensorCores get work under dimension_semantics=("parallel",).
    half = ((b + 1) // 2 + 127) // 128 * 128
    budget = int(0.55 * vmem_cap)
    for cand in (1024, 512, 256, 128):
        if cand <= half and _resident_vmem_needed(cand, d, weight_bytes) <= budget:
            return cand
    return 128


# --------------------------------------------------------------------------
# Path A: (D, D) weight stays VMEM-resident, grid over batch only.
# --------------------------------------------------------------------------
def _svm_attn_kernel(x_ref, wct_ref, bc_ref, wf_ref, bf_ref, h_ref, attn_ref,
                     *, matmul_dtype):
    x = x_ref[...]                                      # (TB, D) f32 batch tile

    # 1x1 conv == x @ Wc.T + bc.  Weight is pre-transposed / pre-cast in the
    # wrapper and stays VMEM-resident (constant index_map, single-buffered).
    proj = jnp.dot(x.astype(matmul_dtype), wct_ref[...],
                   preferred_element_type=jnp.float32) + bc_ref[...]

    # tanh -> softmax(axis=-1) -> exp.  tanh bounds proj to [-1, 1] so the
    # usual max-subtraction is unnecessary.  Exact divide: denom is only
    # (TB, 1), so an approx reciprocal saves nothing while its error would be
    # amplified by the following exp and feed both outputs.
    e = jnp.exp(jnp.tanh(proj))                         # (TB, D), in [e^-1, e]
    denom = jnp.sum(e, axis=-1, keepdims=True)          # (TB, 1)
    attn = jnp.exp(e / denom)                           # (TB, D)

    out = x * attn                                      # (TB, D)

    # fc: Linear(D, 1) as VPU multiply + cross-lane (XLU) reduction; a
    # (TB,D)x(D,1) matmul would waste the MXU's N dimension.
    h_ref[...] = jnp.sum(out * wf_ref[...], axis=-1, keepdims=True) + bf_ref[0, 0]
    attn_ref[...] = attn


# --------------------------------------------------------------------------
# Path B: D-tiled fallback when the (D, D) weight cannot stay VMEM-resident.
# Grid = (batch tiles, K chunks); K axis last, "arbitrary", f32 accumulator.
# --------------------------------------------------------------------------
def _svm_attn_kernel_dtiled(x_ref, wct_ref, bc_ref, wf_ref, bf_ref,
                            h_ref, attn_ref, acc_ref, *, tk, matmul_dtype):
    k = pl.program_id(1)

    @pl.when(k == 0)
    def _():
        acc_ref[...] = jnp.zeros_like(acc_ref)

    # k-th column-chunk of x against the k-th row-chunk of Wc.T.
    off = pl.multiple_of(k * tk, tk)
    x_chunk = x_ref[:, pl.ds(off, tk)]                  # (TB, TK)
    acc_ref[...] += jnp.dot(x_chunk.astype(matmul_dtype), wct_ref[...],
                            preferred_element_type=jnp.float32)

    @pl.when(k == pl.num_programs(1) - 1)
    def _():
        x = x_ref[...]
        proj = acc_ref[...] + bc_ref[...]
        e = jnp.exp(jnp.tanh(proj))
        denom = jnp.sum(e, axis=-1, keepdims=True)
        attn = jnp.exp(e / denom)
        out = x * attn
        h_ref[...] = jnp.sum(out * wf_ref[...], axis=-1, keepdims=True) + bf_ref[0, 0]
        attn_ref[...] = attn


def linear_svm_forward(x, wc, bc, wf, bf, *, matmul_dtype=jnp.float32,
                       force_d_tiled=False, tk=None):
    """x: (B, D) float32. Returns (h: (B, 1), attention: (B, D)).

    matmul_dtype=jnp.bfloat16 is recommended on v5e/v6e/v7x once D is large
    enough for the projection to be MXU-bound (also halves weight DMA /
    residency); the float32 default preserves exact module semantics.
    """
    B, D = x.shape
    f32 = 4
    wsize = jnp.dtype(matmul_dtype).itemsize
    vmem_cap = _vmem_capacity_bytes()

    wc_t = wc.T.astype(matmul_dtype)                    # one-time transpose + cast (XLA)
    bc2 = bc.reshape(1, D).astype(jnp.float32)
    wf2 = wf.reshape(1, D).astype(jnp.float32)
    bf2 = bf.reshape(1, 1).astype(jnp.float32)

    weight_bytes = D * D * wsize
    use_d_tiled = force_d_tiled or (weight_bytes > vmem_cap // 4 and D % 128 == 0)

    out_shape = (
        jax.ShapeDtypeStruct((B, 1), jnp.float32),
        jax.ShapeDtypeStruct((B, D), jnp.float32),
    )

    if not use_d_tiled:
        TB = _pick_tb(B, D, weight_bytes, vmem_cap)
        grid = (pl.cdiv(B, TB),)
        needed = _resident_vmem_needed(TB, D, weight_bytes)
        vmem_limit = int(min(0.85 * vmem_cap, max(32 * _MIB, 1.5 * needed)))

        kernel = functools.partial(_svm_attn_kernel, matmul_dtype=matmul_dtype)
        h, attn = pl.pallas_call(
            kernel,
            grid=grid,
            out_shape=out_shape,
            in_specs=[
                pl.BlockSpec((TB, D), lambda i: (i, 0)),          # x: batch-tiled
                # Constant-index weights: single-buffered (no benefit from
                # double-buffering, halves resident footprint).
                pl.BlockSpec((D, D), lambda i: (0, 0),
                             pipeline_mode=pl.Buffered(1)),        # Wc.T resident
                pl.BlockSpec((1, D), lambda i: (0, 0),
                             pipeline_mode=pl.Buffered(1)),        # bc resident
                pl.BlockSpec((1, D), lambda i: (0, 0),
                             pipeline_mode=pl.Buffered(1)),        # wf resident
                pl.BlockSpec(memory_space=pltpu.MemorySpace.SMEM),  # bf scalar
            ],
            out_specs=(
                pl.BlockSpec((TB, 1), lambda i: (i, 0)),          # h
                pl.BlockSpec((TB, D), lambda i: (i, 0)),          # attn (lane-dense)
            ),
            compiler_params=pltpu.CompilerParams(
                dimension_semantics=("parallel",),
                vmem_limit_bytes=vmem_limit,
            ),
        )(x, wc_t, bc2, wf2, bf2)
        return h, attn

    # ---- D-tiled fallback: (D, D) weight too large to keep resident. ----
    assert D % 128 == 0, "D-tiled path requires D to be a multiple of 128"
    if tk is None:
        tk = 512 if D % 512 == 0 else (256 if D % 256 == 0 else 128)
    assert D % tk == 0 and (tk % 128 == 0 or tk == D)
    TB = _pick_tb(B, D, 2 * tk * D * wsize, vmem_cap)
    grid = (pl.cdiv(B, TB), D // tk)

    tile = TB * D * f32
    needed = (2 * tile                 # x tile (constant across k), double-buffered
              + 2 * tk * D * wsize     # weight chunk, double-buffered over k
              + 2 * tile + 2 * TB * f32  # attn / h outputs
              + tile                   # accumulator scratch
              + 3 * tile               # epilogue intermediates
              + 4 * D * f32)           # bc, wf
    vmem_limit = int(min(0.85 * vmem_cap, max(32 * _MIB, 1.5 * needed)))

    kernel = functools.partial(_svm_attn_kernel_dtiled, tk=tk,
                               matmul_dtype=matmul_dtype)
    h, attn = pl.pallas_call(
        kernel,
        grid=grid,
        out_shape=out_shape,
        in_specs=[
            pl.BlockSpec((TB, D), lambda i, k: (i, 0)),           # full x tile, sliced per k
            pl.BlockSpec((tk, D), lambda i, k: (k, 0)),           # k-th row-chunk of Wc.T
            pl.BlockSpec((1, D), lambda i, k: (0, 0),
                         pipeline_mode=pl.Buffered(1)),            # bc resident
            pl.BlockSpec((1, D), lambda i, k: (0, 0),
                         pipeline_mode=pl.Buffered(1)),            # wf resident
            pl.BlockSpec(memory_space=pltpu.MemorySpace.SMEM),     # bf scalar
        ],
        out_specs=(
            pl.BlockSpec((TB, 1), lambda i, k: (i, 0)),
            pl.BlockSpec((TB, D), lambda i, k: (i, 0)),
        ),
        scratch_shapes=[pltpu.VMEM((TB, D), jnp.float32)],         # proj accumulator
        compiler_params=pltpu.CompilerParams(
            dimension_semantics=("parallel", "arbitrary"),
            vmem_limit_bytes=vmem_limit,
        ),
    )(x, wc_t, bc2, wf2, bf2)
    return h, attn


def init_params(key, input_dim):
    """Deterministic parameter init (PyTorch-style uniform fan-in bounds)."""
    k1, k2, k3, k4 = jax.random.split(key, 4)
    bound = 1.0 / jnp.sqrt(jnp.float32(input_dim))
    # Conv2d(D, D, kernel_size=1) weight (D, D, 1, 1) squeezed to (D, D)
    wc = jax.random.uniform(k1, (input_dim, input_dim), jnp.float32, -bound, bound)
    bc = jax.random.uniform(k2, (input_dim,), jnp.float32, -bound, bound)
    # Linear(input_dim, 1)
    wf = jax.random.uniform(k3, (1, input_dim), jnp.float32, -bound, bound)
    bf = jax.random.uniform(k4, (1,), jnp.float32, -bound, bound)
    return wc, bc, wf, bf


def _reference(x, wc, bc, wf, bf):
    hp = jax.lax.Precision.HIGHEST
    proj = jnp.dot(x, wc.T, precision=hp) + bc
    sm = jax.nn.softmax(jnp.tanh(proj), axis=-1)
    attn = jnp.exp(sm)
    h = jnp.dot(x * attn, wf.T, precision=hp) + bf
    return h, attn


if __name__ == "__main__":
    key = jax.random.PRNGKey(0)
    kx, kp = jax.random.split(key)

    # Small shapes consistent with the module: LinearSVM(input_dim=32) on a
    # (batch=8, features=32) input (the 1x1 Conv2d sees (B, 32, 1, 1)).
    B, D = 8, 32
    x = jax.random.normal(kx, (B, D), dtype=jnp.float32)
    wc, bc, wf, bf = init_params(kp, D)

    h, attn = jax.jit(linear_svm_forward)(x, wc, bc, wf, bf)
    jax.block_until_ready((h, attn))
    h_ref, attn_ref = _reference(x, wc, bc, wf, bf)
    assert h.shape == (B, 1) and attn.shape == (B, D)
    assert jnp.allclose(h, h_ref, atol=1e-3, rtol=1e-3)
    assert jnp.allclose(attn, attn_ref, atol=1e-3, rtol=1e-3)

    # Exercise the D-tiled fallback path (used when the (D, D) weight can't
    # stay VMEM-resident) at a small, 128-aligned D with 2 K-chunks.
    B2, D2 = 16, 256
    x2 = jax.random.normal(kx, (B2, D2), dtype=jnp.float32)
    wc2, bc2, wf2, bf2 = init_params(kp, D2)
    fwd_dt = jax.jit(functools.partial(linear_svm_forward,
                                       force_d_tiled=True, tk=128))
    h2, attn2 = fwd_dt(x2, wc2, bc2, wf2, bf2)
    jax.block_until_ready((h2, attn2))
    h2_ref, attn2_ref = _reference(x2, wc2, bc2, wf2, bf2)
    assert h2.shape == (B2, 1) and attn2.shape == (B2, D2)
    assert jnp.allclose(h2, h2_ref, atol=1e-3, rtol=1e-3)
    assert jnp.allclose(attn2, attn2_ref, atol=1e-3, rtol=1e-3)

    print("KERNEL_OK")
</pallas_src>

<mosaic_0001>
module attributes {stable_mosaic.version = 11 : i64} {
  func.func @_svm_attn_kernel(%arg0: i32, %arg1: memref<8x32xf32, #tpu.memory_space<vmem>>, %arg2: memref<32x32xf32, #tpu.memory_space<vmem>>, %arg3: memref<1x32xf32, #tpu.memory_space<vmem>>, %arg4: memref<1x32xf32, #tpu.memory_space<vmem>>, %arg5: memref<1x1xf32, #tpu.memory_space<smem>>, %arg6: memref<8x1xf32, #tpu.memory_space<vmem>>, %arg7: memref<8x32xf32, #tpu.memory_space<vmem>>) attributes {dimension_semantics = [#tpu.dimension_semantics<parallel>], iteration_bounds = array<i64: 1>, scalar_prefetch = 0 : i64, scratch_operands = 0 : i64, tpu.core_type = #tpu.core_type<tc>, window_params = [{transform_indices = @transform_0, window_bounds = array<i64: 8, 32>}, {pipeline_mode = #tpu.pipeline_mode<synchronous>, transform_indices = @transform_1, window_bounds = array<i64: 32, 32>}, {pipeline_mode = #tpu.pipeline_mode<synchronous>, transform_indices = @transform_2, window_bounds = array<i64: 1, 32>}, {pipeline_mode = #tpu.pipeline_mode<synchronous>, transform_indices = @transform_3, window_bounds = array<i64: 1, 32>}, {transform_indices = @transform_4, window_bounds = array<i64: 1, 1>}, {transform_indices = @transform_5, window_bounds = array<i64: 8, 1>}, {transform_indices = @transform_6, window_bounds = array<i64: 8, 32>}]} {
    %c0 = arith.constant 0 : index
    %c0_0 = arith.constant 0 : index
    %0 = vector.load %arg1[%c0, %c0_0] : memref<8x32xf32, #tpu.memory_space<vmem>>, vector<8x32xf32>
    %c0_1 = arith.constant 0 : index
    %c0_2 = arith.constant 0 : index
    %1 = vector.load %arg2[%c0_1, %c0_2] : memref<32x32xf32, #tpu.memory_space<vmem>>, vector<32x32xf32>
    %cst = arith.constant dense<0.000000e+00> : vector<8x32xf32>
    %2 = tpu.matmul %0, %1, %cst {dimension_numbers = #tpu.dot_dimension_numbers<[1], [0], [0], [1], [0, 0, 1, 1], [], []>} : vector<8x32xf32>, vector<32x32xf32>, vector<8x32xf32> -> vector<8x32xf32>
    %c0_3 = arith.constant 0 : index
    %c0_4 = arith.constant 0 : index
    %3 = vector.load %arg3[%c0_3, %c0_4] : memref<1x32xf32, #tpu.memory_space<vmem>>, vector<1x32xf32>
    %4 = vector.broadcast %3 : vector<1x32xf32> to vector<8x32xf32>
    %5 = arith.addf %2, %4 : vector<8x32xf32>
    %6 = math.tanh %5 : vector<8x32xf32>
    %7 = math.exp %6 : vector<8x32xf32>
    %cst_5 = arith.constant dense<0.000000e+00> : vector<8xf32>
    %8 = vector.multi_reduction <add>, %7, %cst_5 [1] : vector<8x32xf32> to vector<8xf32>
    %9 = vector.shape_cast %8 : vector<8xf32> to vector<8x1xf32>
    %10 = vector.broadcast %9 : vector<8x1xf32> to vector<8x32xf32>
    %11 = arith.divf %7, %10 : vector<8x32xf32>
    %12 = math.exp %11 : vector<8x32xf32>
    %13 = arith.mulf %0, %12 : vector<8x32xf32>
    %c0_6 = arith.constant 0 : index
    %c0_7 = arith.constant 0 : index
    %14 = vector.load %arg4[%c0_6, %c0_7] : memref<1x32xf32, #tpu.memory_space<vmem>>, vector<1x32xf32>
    %15 = vector.broadcast %14 : vector<1x32xf32> to vector<8x32xf32>
    %16 = arith.mulf %13, %15 : vector<8x32xf32>
    %cst_8 = arith.constant dense<0.000000e+00> : vector<8xf32>
    %17 = vector.multi_reduction <add>, %16, %cst_8 [1] : vector<8x32xf32> to vector<8xf32>
    %18 = vector.shape_cast %17 : vector<8xf32> to vector<8x1xf32>
    %c0_9 = arith.constant 0 : index
    %c0_10 = arith.constant 0 : index
    %19 = memref.load %arg5[%c0_9, %c0_10] : memref<1x1xf32, #tpu.memory_space<smem>>
    %20 = vector.broadcast %19 : f32 to vector<8x1xf32>
    %21 = arith.addf %18, %20 : vector<8x1xf32>
    %c0_11 = arith.constant 0 : index
    %c0_12 = arith.constant 0 : index
    %22 = vector.load %arg6[%c0_11, %c0_12] : memref<8x1xf32, #tpu.memory_space<vmem>>, vector<8x1xf32>
    tpu.vector_store %arg6[%c0_11, %c0_12], %21 {strides = array<i32>} : memref<8x1xf32, #tpu.memory_space<vmem>>, vector<8x1xf32>,
    %c0_13 = arith.constant 0 : index
    %c0_14 = arith.constant 0 : index
    %23 = vector.load %arg7[%c0_13, %c0_14] : memref<8x32xf32, #tpu.memory_space<vmem>>, vector<8x32xf32>
    tpu.vector_store %arg7[%c0_13, %c0_14], %12 {strides = array<i32>} : memref<8x32xf32, #tpu.memory_space<vmem>>, vector<8x32xf32>,
    return
  }
  func.func @transform_0(%arg0: i32) -> (i32, i32) {
    %c0_i32 = arith.constant 0 : i32
    %c0_i32_0 = arith.constant 0 : i32
    return %arg0, %c0_i32 : i32, i32
  }
  func.func @transform_1(%arg0: i32) -> (i32, i32) {
    %c0_i32 = arith.constant 0 : i32
    %c0_i32_0 = arith.constant 0 : i32
    %c0_i32_1 = arith.constant 0 : i32
    return %c0_i32, %c0_i32_0 : i32, i32
  }
  func.func @transform_2(%arg0: i32) -> (i32, i32) {
    %c0_i32 = arith.constant 0 : i32
    %c0_i32_0 = arith.constant 0 : i32
    %c0_i32_1 = arith.constant 0 : i32
    return %c0_i32, %c0_i32_0 : i32, i32
  }
  func.func @transform_3(%arg0: i32) -> (i32, i32) {
    %c0_i32 = arith.constant 0 : i32
    %c0_i32_0 = arith.constant 0 : i32
    %c0_i32_1 = arith.constant 0 : i32
    return %c0_i32, %c0_i32_0 : i32, i32
  }
  func.func @transform_4(%arg0: i32) -> (i32, i32) {
    %c0_i32 = arith.constant 0 : i32
    %c0_i32_0 = arith.constant 0 : i32
    %c0_i32_1 = arith.constant 0 : i32
    return %c0_i32, %c0_i32_0 : i32, i32
  }
  func.func @transform_5(%arg0: i32) -> (i32, i32) {
    %c0_i32 = arith.constant 0 : i32
    %c0_i32_0 = arith.constant 0 : i32
    return %arg0, %c0_i32 : i32, i32
  }
  func.func @transform_6(%arg0: i32) -> (i32, i32) {
    %c0_i32 = arith.constant 0 : i32
    %c0_i32_0 = arith.constant 0 : i32
    return %arg0, %c0_i32 : i32, i32
  }
}

</mosaic_0001>

<bundles_post_ra>
// kernel: linear_svm_forward.1
= control target key start
LH: loop header
LB: loop body
LE: loop exit
PB: predicated region body
PF: predicated region fallthrough
CT: control target
= control target key end

     0   :  { %v208_v1 = vmov 0.0   ;;  %vm209_vm0 = vmmov 0   ;;  %s280_s0 = inlined_call_operand.vmem [shape: f32[8,32], index: 0, kind: input, shape index: {}]   ;;  %s281_s1 = inlined_call_operand.vmem [shape: f32[32,32], index: 1, kind: input, shape index: {}]   ;;  %s282_s2 = inlined_call_operand.vmem [shape: f32[1,32], index: 2, kind: input, shape index: {}]   ;;  %s283_s3 = inlined_call_operand.vmem [shape: f32[1,32], index: 3, kind: input, shape index: {}]   ;;  %s284_s4 = inlined_call_operand.<no memory space> [shape: f32[1,1], index: 4, kind: input, shape index: {}]   ;;  %s285_s5 = inlined_call_operand.vmem [shape: f32[8,1], index: 5, kind: output, shape index: {0}]   ;;  %s286_s6 = inlined_call_operand.hbm [shape: f32[8,32], index: 6, kind: output, shape index: {1}]  }
   0x1   :  { %v28_v0 = vld [vmem:[%s281_s1 + $0x18] sm:$0xff]  ;;  %164 = vmatprep.subr.mxu0 %v208_v1  ;;  %v27_v2 = vld [vmem:[%s281_s1 + $0x10] sm:$0xff]  ;;  %172 = vmatprep.mubr.msk.f32.mxu0 %vm209_vm0, %v208_v1 }
   0x2   :  { %165 = vmatpush3.msra.mxu0 %v28_v0 }
   0x3   :  { %13 = vsyncpa [#allocation4], 0  ;;  %166 = vmatprep.subr.mxu0 %v208_v1  ;;  %v26_v3 = vld [vmem:[%s281_s1 + $0x8] sm:$0xff]  ;;  %v25_v4 = vld [vmem:[%s281_s1] sm:$0xff]  ;;  %vm36_vm1 = vcmask 261120  }
   0x4   :  { %167 = vmatpush3.msra.mxu0 %v27_v2  ;;  %v24_v5 = vld [vmem:[%s280_s0] sm:$0xff] }
   0x5   :  { %168 = vmatprep.subr.mxu0 %v208_v1  ;;  %v156_v6 = vld [vmem:[%s282_s2] ss:$0 sm:$0xff]  ;;  %s210_s2 = smov [#allocation3]  }
   0x6   :  { %169 = vmatpush3.msra.mxu0 %v26_v3  ;;  %v158_v19 = vld [vmem:[%s283_s3] ss:$0 sm:$0xff]  ;;  %s146_s9 = sshll.u32 %s210_s2, 4  ;;  %s147_s9 = int_to_ptr.vmem [resolvable:$true] %s146_s9 }
   0x7   :  { %170 = vmatprep.subr.mxu0 %v208_v1  ;;  %s186_s10 = scalar_lea.vmem %s147_s9, 128  ;;  %p191_p1 = scmp.lt.s32.totalorder %s147_s9, %s147_s9 }
   0x8   :  { %171 = vmatpush3.msra.mxu0 %v25_v4  ;;  %p187_p0 = scmp.ne.s32.totalorder %s147_s9, %s186_s10  ;;  %p192_p2 = scmp.lt.s32.totalorder %s186_s10, %s186_s10 }
   0x9   :  { %173 = vmatmul.mubr.msk.f32.vlgmr.msra.gmra.mxu0 %vm36_vm1, %v24_v5 }
   0xa   :  { %p193_p3 = por %p192_p2, %p191_p1 }
   0xc   :  { %p194_p4 = pnand %p193_p3, %p187_p0 }
  0xc9   :  { %v106_v7 = vpop.f32.mrf.mxu0 }
  0xca   :  { %v107_v8 = vadd.f32 %v156_v6, %v106_v7 }
  0xcb   :  { %v174_v9 = vpop.f32.mrf.mxu0 }
  0xcc   :  { %178 = vtanh.f32 %v107_v8 }
  0xd9   :  { %v179_v10 = vpop.eup %178 }
  0xda   :  { %v111_v11 = vmul.f32 1.442695, %v179_v10 }
  0xdc   :  { %180 = vpow2.f32 %v111_v11 }
  0xe9   :  { %v181_v12 = vpop.eup %180 }
  0xea   :  { %v113_v13 = vsel %vm36_vm1, %v181_v12, 0.0 }
  0xeb   :  { %114 = vadd.xlane.f32.xlu0 %v113_v13 }
 0x174   :  { %v115_v14 = vpop.xlane.xlu0 %114 }
 0x175   :  { %182 = vrcp.f32 %v115_v14 }
 0x182   :  { %v183_v15 = vpop.eup %182 }
 0x183   :  { %v117_v16 = vmul.f32 %v183_v15, %v181_v12 }
 0x185   :  { %v118_v17 = vmul.f32 1.442695, %v117_v16 }
 0x187   :  { %184 = vpow2.f32 %v118_v17 }
 0x194   :  { %v185_v18 = vpop.eup %184 }
 0x195   :  { %137 = vst.msk [vmem:[#allocation3] sm:$0xff] %vm36_vm1, %v185_v18  ;;  %v120_v20 = vmul.f32 %v185_v18, %v24_v5 }
 0x197   :  { %v128_v21 = vmul.f32 %v158_v19, %v120_v20 }
 0x199   :  { %v129_v22 = vsel %vm36_vm1, %v128_v21, 0.0 }
 0x19a   :  { %130 = vadd.xlane.f32.xlu0 %v129_v22 }
 0x19b   :  { %197 = shalt.err (!%p194_p4)
}
 0x19c   :  { %149 = dma.vmem_to_hbm [thread:$0]  %s147_s9, 128, %s286_s6, [#allocation4]   ;;  %v133_v23 = vstv %s284_s4  ;;  %vm135_vm2 = vcmask 7168  }
 0x223   :  { %v131_v24 = vpop.xlane.xlu0 %130 }
 0x224   :  { %v134_v25 = vadd.f32 %v133_v23, %v131_v24 }
 0x226   :  { %136 = vst.msk [vmem:[%s285_s5] sm:$0xff] %vm135_vm2, %v134_v25 }
 0x227   :  { %206 = dma.done.wait [#allocation4], 128  }
 0x228   :  { %207 = vsyncadd [#allocation4], 4294967168 }
 0x229   :  { %155 = vsyncpa [#allocation4], 1 }

</bundles_post_ra>
